<compile_context>
chip_gen: v7x
topology: tpu7x:2x2x1
jax: 0.10.0
libtpu: 0.0.40
codegen_flags: <defaults>
</compile_context>

<pallas_src>
import jax
import jax.numpy as jnp
from jax.experimental import pallas as pl
from jax.experimental.pallas import tpu as pltpu


# ----------------------------------------------------------------------------
# Kernel 1: fused q/k/v 1x1x1 Conv3d == one tiled pointwise matmul
# ----------------------------------------------------------------------------
def _qkv_proj_kernel(x_ref, w_ref, b_ref, o_ref):
    # x_ref: (TM, Cin), w_ref: (Cin, Ctot), b_ref: (1, Ctot)
    acc = jnp.dot(x_ref[...], w_ref[...], preferred_element_type=jnp.float32)
    o_ref[...] = (acc + b_ref[...]).astype(o_ref.dtype)


def fused_qkv_projection(x_flat, w_all, b_all, out_dtype=jnp.bfloat16, tm=512):
    """x_flat: (Nvox, Cin); w_all: (Cin, Ctot); b_all: (1, Ctot)."""
    Nv, Cin = x_flat.shape
    Ctot = w_all.shape[1]
    tm = min(tm, Nv)
    while Nv % tm:          # keep the demo grid evenly divisible
        tm //= 2
    return pl.pallas_call(
        _qkv_proj_kernel,
        out_shape=jax.ShapeDtypeStruct((Nv, Ctot), out_dtype),
        grid=(Nv // tm,),
        in_specs=[
            pl.BlockSpec((tm, Cin), lambda i: (i, 0)),      # x rows, pipelined
            pl.BlockSpec((Cin, Ctot), lambda i: (0, 0)),    # fused weights
            pl.BlockSpec((1, Ctot), lambda i: (0, 0)),      # fused bias
        ],
        out_specs=pl.BlockSpec((tm, Ctot), lambda i: (i, 0)),
        compiler_params=pltpu.CompilerParams(
            dimension_semantics=("parallel",)),
    )(x_flat, w_all, b_all)


# ----------------------------------------------------------------------------
# Kernel 2: criss-cross attention for one (b, h) slab of W*D query pencils
# ----------------------------------------------------------------------------
def _cca3d_kernel(gamma_ref, q_ref, k_ref, v_ref, kh_ref, vh_ref, x_ref, o_ref):
    h_cur = pl.program_id(1)
    W, D, Cq = q_ref.shape
    C = v_ref.shape[-1]
    H = kh_ref.shape[1]
    N = W * D
    f32 = jnp.float32

    q = q_ref[...]          # (W, D, Cq) bf16   Q(b, h_cur)
    k_row = k_ref[...]      # (W, D, Cq) bf16   K(b, h_cur) -> W-axis AND D-axis keys
    v_row = v_ref[...]      # (W, D, C)  bf16   V(b, h_cur)

    # ---------------- energies ------------------------------------------------
    # D axis (self-masked): e_d[w, d, d'] = q[w,d,:] . k_row[w,d',:]
    #   w-batched (D,Cq)x(Cq,D) contractions on the MXU, f32 accumulate.
    e_d = jnp.einsum("wdc,wec->wde", q, k_row, preferred_element_type=f32)
    # W axis: e_w[w, d, w'] = q[w,d,:] . k_row[w',d,:]   (d-batched on the MXU)
    q_dw = pltpu.einshape("wdc->dwc", q)
    k_dw = pltpu.einshape("wdc->dwc", k_row)
    e_w = jnp.einsum("dwc,dvc->dwv", q_dw, k_dw, preferred_element_type=f32)
    e_w = pltpu.einshape("dwv->wdv", e_w)                        # (W, D, W)
    # H axis (self-masked): per-(w,d) pencil mat-vec over the tiny Cq axis,
    # done as a VPU multiply-reduce against the pre-transposed (N, H, Cq) slab
    # (MXU cannot be used efficiently for an M=1 contraction).
    # TODO(synk): tile over N at production sizes to bound the (N, H, *) temps.
    q_n = q.reshape(N, Cq).astype(f32)
    kh = kh_ref[...].astype(f32)                                 # (N, H, Cq)
    e_h = jnp.sum(q_n[:, None, :] * kh, axis=-1)                 # (N, H)

    # ---------------- self masks (INF3DH / INF3DD) -----------------------------
    neg_inf = f32(-jnp.inf)
    hp = jax.lax.broadcasted_iota(jnp.int32, e_h.shape, 1)
    e_h = jnp.where(hp == h_cur, neg_inf, e_h)                   # key h' == h
    e_h = e_h.reshape(W, D, H)
    di = jax.lax.broadcasted_iota(jnp.int32, e_d.shape, 1)
    dp = jax.lax.broadcasted_iota(jnp.int32, e_d.shape, 2)
    e_d = jnp.where(di == dp, neg_inf, e_d)                      # key d' == d

    # ---------------- joint softmax over the H + W + D key axis (f32) ---------
    m = jnp.maximum(jnp.max(e_h, axis=-1, keepdims=True),
                    jnp.maximum(jnp.max(e_w, axis=-1, keepdims=True),
                                jnp.max(e_d, axis=-1, keepdims=True)))
    p_h = jnp.exp(e_h - m)
    p_w = jnp.exp(e_w - m)
    p_d = jnp.exp(e_d - m)
    s = (jnp.sum(p_h, axis=-1, keepdims=True)
         + jnp.sum(p_w, axis=-1, keepdims=True)
         + jnp.sum(p_d, axis=-1, keepdims=True))
    inv_s = pl.reciprocal(s, approx=True)                        # EUP slot
    a_h = p_h * inv_s                                            # (W, D, H) f32
    a_w = p_w * inv_s                                            # (W, D, W) f32
    a_d = (p_d * inv_s).astype(v_row.dtype)                      # bf16 for MXU

    # ---------------- attention-weighted V sums --------------------------------
    # H axis: VPU multiply-reduce against the (N, H, C) slab.
    vh = vh_ref[...].astype(f32)                                 # (N, H, C)
    out_h = jnp.sum(a_h.reshape(N, H)[:, :, None] * vh, axis=1)  # (N, C)
    out_h = out_h.reshape(W, D, C)
    # W axis (d-batched) and D axis (w-batched): MXU, f32 accumulate.
    a_w_dw = pltpu.einshape("wdv->dwv", a_w).astype(v_row.dtype)
    v_dw = pltpu.einshape("wdc->dwc", v_row)
    out_w = jnp.einsum("dwv,dvc->dwc", a_w_dw, v_dw, preferred_element_type=f32)
    out_w = pltpu.einshape("dwc->wdc", out_w)                    # (W, D, C)
    out_d = jnp.einsum("wde,wec->wdc", a_d, v_row, preferred_element_type=f32)

    gamma = gamma_ref[0]
    out = gamma * (out_h + out_w + out_d) + x_ref[...]           # (W, D, C) f32
    # lane-dense store: minor dim D*C is a multiple of 128 -> unmasked vst.
    o_ref[...] = out.reshape(W, D * C).astype(o_ref.dtype)


# ----------------------------------------------------------------------------
# Wrapper (layout plumbing: transposes / reshapes / parameter fusion)
# ----------------------------------------------------------------------------
def criss_cross_attention_3d(x, params):
    """x: (B, C, H, W, D) float32 (PyTorch layout). Returns same shape."""
    B, C, H, W, D = x.shape
    Cq = params["wq"].shape[0]
    N = W * D

    x_cl = jnp.transpose(x, (0, 2, 3, 4, 1))           # (B, H, W, D, C)
    x_flat = x_cl.reshape(B * H * W * D, C)

    # Fused q/k/v projection: one HBM pass over x instead of three.
    wq = params["wq"].reshape(Cq, C).T                 # (C, Cq)
    wk = params["wk"].reshape(Cq, C).T                 # (C, Cq)
    wv = params["wv"].reshape(C, C).T                  # (C, C)
    w_all = jnp.concatenate([wq, wk, wv], axis=1)      # (C, 2*Cq + C)
    b_all = jnp.concatenate(
        [params["bq"], params["bk"], params["bv"]]).reshape(1, -1)

    qkv = fused_qkv_projection(x_flat, w_all, b_all)   # (Nvox, 2*Cq+C) bf16
    qkv = qkv.reshape(B, H, W, D, 2 * Cq + C)
    q5 = qkv[..., :Cq]                                 # (B, H, W, D, Cq) bf16
    k5 = qkv[..., Cq:2 * Cq]                           # (B, H, W, D, Cq) bf16
    v5 = qkv[..., 2 * Cq:]                             # (B, H, W, D, C)  bf16

    # H-axis key/value slabs pre-transposed to (B, W*D, H, *): fetched once per
    # batch element (block index invariant along the inner grid axis).
    kH = jnp.transpose(k5, (0, 2, 3, 1, 4)).reshape(B, N, H, Cq)
    vH = jnp.transpose(v5, (0, 2, 3, 1, 4)).reshape(B, N, H, C)

    gamma = params["gamma"].reshape(1).astype(jnp.float32)

    out_flat = pl.pallas_call(
        _cca3d_kernel,
        out_shape=jax.ShapeDtypeStruct((B, H, W, D * C), x.dtype),
        grid=(B, H),
        in_specs=[
            pl.BlockSpec(memory_space=pltpu.MemorySpace.SMEM),                   # gamma
            pl.BlockSpec((None, None, W, D, Cq), lambda b, h: (b, h, 0, 0, 0)),  # Q row
            pl.BlockSpec((None, None, W, D, Cq), lambda b, h: (b, h, 0, 0, 0)),  # K row (W+D keys)
            pl.BlockSpec((None, None, W, D, C),  lambda b, h: (b, h, 0, 0, 0)),  # V row (W+D values)
            pl.BlockSpec((None, N, H, Cq),       lambda b, h: (b, 0, 0, 0)),     # K slab (H keys)
            pl.BlockSpec((None, N, H, C),        lambda b, h: (b, 0, 0, 0)),     # V slab (H values)
            pl.BlockSpec((None, None, W, D, C),  lambda b, h: (b, h, 0, 0, 0)),  # x residual row
        ],
        out_specs=pl.BlockSpec((None, None, W, D * C), lambda b, h: (b, h, 0, 0)),
        compiler_params=pltpu.CompilerParams(
            # B axis parallel (even -> shards across v7x's two TensorCores);
            # H axis sequential so the per-batch K/V slabs are not re-fetched.
            dimension_semantics=("parallel", "arbitrary"),
            vmem_limit_bytes=48 * 1024 * 1024),
    )(gamma, q5, k5, v5, kH, vH, x_cl)

    out_cl = out_flat.reshape(B, H, W, D, C)
    return jnp.transpose(out_cl, (0, 4, 1, 2, 3))      # back to (B, C, H, W, D)


# ----------------------------------------------------------------------------
# Pure-JAX f32 reference (faithful port of the torch forward) for validation
# ----------------------------------------------------------------------------
def reference(x, params):
    B, C, H, W, D = x.shape
    x_cl = jnp.transpose(x, (0, 2, 3, 4, 1))

    def proj(w, b):
        w2 = w.reshape(w.shape[0], w.shape[1])
        return jnp.einsum("bhwdc,oc->bhwdo", x_cl, w2) + b

    q = proj(params["wq"], params["bq"])
    k = proj(params["wk"], params["bk"])
    v = proj(params["wv"], params["bv"])
    gamma = params["gamma"].reshape(()).astype(jnp.float32)
    neg_inf = jnp.float32(-jnp.inf)

    eH = jnp.einsum("bhwdc,bgwdc->bhwdg", q, k)
    ih = jax.lax.broadcasted_iota(jnp.int32, eH.shape, 1)
    igh = jax.lax.broadcasted_iota(jnp.int32, eH.shape, 4)
    eH = jnp.where(ih == igh, neg_inf, eH)

    eW = jnp.einsum("bhwdc,bhgdc->bhwdg", q, k)

    eD = jnp.einsum("bhwdc,bhwgc->bhwdg", q, k)
    idd = jax.lax.broadcasted_iota(jnp.int32, eD.shape, 3)
    igd = jax.lax.broadcasted_iota(jnp.int32, eD.shape, 4)
    eD = jnp.where(idd == igd, neg_inf, eD)

    a = jax.nn.softmax(jnp.concatenate([eH, eW, eD], axis=4), axis=4)
    aH, aW, aD = a[..., :H], a[..., H:H + W], a[..., H + W:]

    outH = jnp.einsum("bhwdg,bgwdc->bhwdc", aH, v)
    outW = jnp.einsum("bhwdg,bhgdc->bhwdc", aW, v)
    outD = jnp.einsum("bhwdg,bhwgc->bhwdc", aD, v)

    out_cl = gamma * (outH + outW + outD) + x_cl
    return jnp.transpose(out_cl, (0, 4, 1, 2, 3))


if __name__ == "__main__":
    B, C, H, W, D = 2, 32, 8, 8, 8        # in_dim = 32  ->  Cq = 4
    Cq = C // 8

    key = jax.random.PRNGKey(0)
    ks = jax.random.split(key, 8)
    x = jax.random.normal(ks[0], (B, C, H, W, D), jnp.float32)

    # Deterministic parameters (shapes per nn.Conv3d / nn.Parameter in __init__).
    # NOTE: torch init has gamma = 0 (output == x); use 0.5 here so the
    # attention path is actually exercised.
    params = {
        "wq": 0.1 * jax.random.normal(ks[1], (Cq, C, 1, 1, 1), jnp.float32),
        "bq": 0.1 * jax.random.normal(ks[2], (Cq,), jnp.float32),
        "wk": 0.1 * jax.random.normal(ks[3], (Cq, C, 1, 1, 1), jnp.float32),
        "bk": 0.1 * jax.random.normal(ks[4], (Cq,), jnp.float32),
        "wv": 0.1 * jax.random.normal(ks[5], (C, C, 1, 1, 1), jnp.float32),
        "bv": 0.1 * jax.random.normal(ks[6], (C,), jnp.float32),
        "gamma": jnp.array([0.5], jnp.float32),
    }

    out = jax.block_until_ready(criss_cross_attention_3d(x, params))
    ref = jax.block_until_ready(reference(x, params))

    assert out.shape == x.shape, (out.shape, x.shape)
    # Kernel runs a bf16 Q/K/V path with f32 accumulation plus an approximate
    # softmax reciprocal; compare against the f32 reference with a tolerance
    # that covers the bf16 quantization (~2e-3 relative on the attention term).
    if not bool(jnp.allclose(out, ref, atol=3e-2, rtol=3e-2)):
        raise AssertionError(
            f"mismatch, max abs diff = {float(jnp.max(jnp.abs(out - ref)))}")
    print("KERNEL_OK")
</pallas_src>

<mosaic_0001>
module attributes {stable_mosaic.version = 11 : i64} {
  func.func @_qkv_proj_kernel(%arg0: i32, %arg1: memref<512x32xf32, #tpu.memory_space<vmem>>, %arg2: memref<32x40xf32, #tpu.memory_space<vmem>>, %arg3: memref<1x40xf32, #tpu.memory_space<vmem>>, %arg4: memref<512x40xbf16, #tpu.memory_space<vmem>>) attributes {dimension_semantics = [#tpu.dimension_semantics<parallel>], iteration_bounds = array<i64: 2>, scalar_prefetch = 0 : i64, scratch_operands = 0 : i64, tpu.core_type = #tpu.core_type<tc>, window_params = [{transform_indices = @transform_0, window_bounds = array<i64: 512, 32>}, {pipeline_mode = #tpu.pipeline_mode<synchronous>, transform_indices = @transform_1, window_bounds = array<i64: 32, 40>}, {pipeline_mode = #tpu.pipeline_mode<synchronous>, transform_indices = @transform_2, window_bounds = array<i64: 1, 40>}, {transform_indices = @transform_3, window_bounds = array<i64: 512, 40>}]} {
    %c0 = arith.constant 0 : index
    %c0_0 = arith.constant 0 : index
    %0 = vector.load %arg1[%c0, %c0_0] : memref<512x32xf32, #tpu.memory_space<vmem>>, vector<512x32xf32>
    %c0_1 = arith.constant 0 : index
    %c0_2 = arith.constant 0 : index
    %1 = vector.load %arg2[%c0_1, %c0_2] : memref<32x40xf32, #tpu.memory_space<vmem>>, vector<32x40xf32>
    %cst = arith.constant dense<0.000000e+00> : vector<512x40xf32>
    %2 = tpu.matmul %0, %1, %cst {dimension_numbers = #tpu.dot_dimension_numbers<[1], [0], [0], [1], [0, 0, 1, 1], [], []>} : vector<512x32xf32>, vector<32x40xf32>, vector<512x40xf32> -> vector<512x40xf32>
    %c0_3 = arith.constant 0 : index
    %c0_4 = arith.constant 0 : index
    %3 = vector.load %arg3[%c0_3, %c0_4] : memref<1x40xf32, #tpu.memory_space<vmem>>, vector<1x40xf32>
    %4 = vector.broadcast %3 : vector<1x40xf32> to vector<512x40xf32>
    %5 = arith.addf %2, %4 : vector<512x40xf32>
    %6 = arith.truncf %5 : vector<512x40xf32> to vector<512x40xbf16>
    %c0_5 = arith.constant 0 : index
    %c0_6 = arith.constant 0 : index
    %7 = vector.load %arg4[%c0_5, %c0_6] : memref<512x40xbf16, #tpu.memory_space<vmem>>, vector<512x40xbf16>
    tpu.vector_store %arg4[%c0_5, %c0_6], %6 {strides = array<i32>} : memref<512x40xbf16, #tpu.memory_space<vmem>>, vector<512x40xbf16>,
    return
  }
  func.func @transform_0(%arg0: i32) -> (i32, i32) {
    %c0_i32 = arith.constant 0 : i32
    %c0_i32_0 = arith.constant 0 : i32
    return %arg0, %c0_i32 : i32, i32
  }
  func.func @transform_1(%arg0: i32) -> (i32, i32) {
    %c0_i32 = arith.constant 0 : i32
    %c0_i32_0 = arith.constant 0 : i32
    %c0_i32_1 = arith.constant 0 : i32
    return %c0_i32, %c0_i32_0 : i32, i32
  }
  func.func @transform_2(%arg0: i32) -> (i32, i32) {
    %c0_i32 = arith.constant 0 : i32
    %c0_i32_0 = arith.constant 0 : i32
    %c0_i32_1 = arith.constant 0 : i32
    return %c0_i32, %c0_i32_0 : i32, i32
  }
  func.func @transform_3(%arg0: i32) -> (i32, i32) {
    %c0_i32 = arith.constant 0 : i32
    %c0_i32_0 = arith.constant 0 : i32
    return %arg0, %c0_i32 : i32, i32
  }
}

</mosaic_0001>

<bundles_post_ra>
// kernel: tpu_custom_call.1
= control target key start
LH: loop header
LB: loop body
LE: loop exit
PB: predicated region body
PF: predicated region fallthrough
CT: control target
= control target key end

     0   :  { %s1628_s12 = smov 0   ;;  %s1990_s0 = inlined_call_operand.vmem [shape: f32[1024,32], index: 0, kind: input, shape index: {}]   ;;  %s1991_s1 = inlined_call_operand.vmem [shape: f32[32,40], index: 1, kind: input, shape index: {}]   ;;  %s1992_s2 = inlined_call_operand.vmem [shape: f32[1,40], index: 2, kind: input, shape index: {}]   ;;  %s1993_s3 = inlined_call_operand.vmem [shape: bf16[1024,40], index: 3, kind: output, shape index: {}]  }
   0x1 LB: > { %s1204_s13 = sadd.s32 4294967295, %s1606_s12   ;;  %p1208_p0 = scmp.ge.s32.totalorder %s1606_s12, 1  ;;  %s1606_s12 = sphi %s1628_s12, %s13_s12  }
   0x2   : > { %p138_p1 = scmp.lt.s32.totalorder %s1606_s12, 3 }
   0x4   : > { %p139_p2 = pnand %p1208_p0, %p138_p1 }
   0x5   : > { %v238_v0 = vld [vmem:[%s1991_s1] sm:$0xff] (!%p139_p2)  ;;  %v239_v1 = vld [vmem:[%s1991_s1 + $0x8] sm:$0xff] (!%p139_p2)  ;;  %v240_v2 = vld [vmem:[%s1991_s1 + $0x10] sm:$0xff] (!%p139_p2)  ;;  %s1209_s20 = sshll.u32 (!%p139_p2), %s1204_s13, 6  ;;  %vm249_vm0 = vcmask (!%p139_p2), 261120   ;;  %vm1083_vm1 = vcmask (!%p139_p2), 322560  }
   0x6   : > { %142 = sbr.rel (%p139_p2) target bundleno = 297 (0x129), region = 32  ;;  %v1580_v3 = vpack.c.bf16 (!%p139_p2), %v239_v1, %v238_v0  ;;  %v241_v4 = vld [vmem:[%s1991_s1 + $0x18] sm:$0xff] (!%p139_p2)  ;;  %p163_p3 = scmp.lt.s32.totalorder (!%p139_p2), %s1209_s20, 127 }
   0x7   : > { %v1584_v5 = vpack.c.bf16 (!%p139_p2), %v241_v4, %v240_v2 }
   0x8   : > { %1581 = vmatprep.subr.bf16.mxu0 (!%p139_p2), %v1580_v3  ;;  %1588 = vmatprep.subr.bf16.mxu1 (!%p139_p2), %v1580_v3 }
   0x9   : > { %1583 = vmatpush3.bf16.msra.mxu0 (!%p139_p2), %v1580_v3  ;;  %1590 = vmatpush3.bf16.msra.mxu1 (!%p139_p2), %v1580_v3 }
   0xa   : > { %1585 = vmatprep.subr.bf16.mxu0 (!%p139_p2), %v1584_v5  ;;  %1589 = vmatprep.subr.bf16.mxu1 (!%p139_p2), %v1584_v5 }
   0xd   : > { %s1995_s20 = smov (!%p163_p3, %s1209_s20), 127  ;;  %1587 = vmatpush3.bf16.msra.mxu0 %v1584_v5  ;;  %1591 = vmatpush3.bf16.msra.mxu1 %v1584_v5 }
   0xe   : > { %s1210_s23 = sshll.u32 %s1995_s20, 3  ;;  %s1212_s29 = sshll.u32 %s1995_s20, 2 }
   0xf   : > { %s1654_s26 = scalar_lea.vmem %s1990_s0, %s1210_s23  ;;  %s1795_s5 = scalar_lea.vmem %s1993_s3, %s1212_s29 }
  0x10   : > { %v174_v6 = vld [vmem:[%s1654_s26] sm:$0xff]  ;;  %v175_v8 = vld [vmem:[%s1654_s26 + $0x8] sm:$0xff]  ;;  %v176_v10 = vld [vmem:[%s1654_s26 + $0x10] sm:$0xff] }
  0x11   : > { %v206_v7 = vld [vmem:[%s1654_s26 + $0x100] sm:$0xff]  ;;  %v207_v9 = vld [vmem:[%s1654_s26 + $0x108] sm:$0xff]  ;;  %1484 = vmatprep.mubr.msk.f32.mxu0 %vm249_vm0, %v174_v6  ;;  %v208_v11 = vld [vmem:[%s1654_s26 + $0x110] sm:$0xff] }
  0x12   : > { %1532 = vmatprep.mubr.msk.f32.mxu1 %vm249_vm0, %v206_v7  ;;  %1485 = vmatmul.mubr.msk.f32.vlgmr.msra.gmra.mrb[0].mxu0 %vm249_vm0, %v175_v8  ;;  %v177_v12 = vld [vmem:[%s1654_s26 + $0x18] sm:$0xff]  ;;  %v178_v14 = vld [vmem:[%s1654_s26 + $0x20] sm:$0xff]  ;;  %v179_v16 = vld [vmem:[%s1654_s26 + $0x28] sm:$0xff] }
  0x13   : > { %1533 = vmatmul.mubr.msk.f32.vlgmr.msra.gmra.mrb[0].mxu1 %vm249_vm0, %v207_v9  ;;  %1487 = vmatprep.mubr.msk.f32.mxu0 %vm249_vm0, %v176_v10  ;;  %v209_v13 = vld [vmem:[%s1654_s26 + $0x118] sm:$0xff]  ;;  %v210_v15 = vld [vmem:[%s1654_s26 + $0x120] sm:$0xff]  ;;  %v211_v17 = vld [vmem:[%s1654_s26 + $0x128] sm:$0xff] }
  0x14   : > { %1535 = vmatprep.mubr.msk.f32.mxu1 %vm249_vm0, %v208_v11  ;;  %v180_v18 = vld [vmem:[%s1654_s26 + $0x30] sm:$0xff]  ;;  %v181_v20 = vld [vmem:[%s1654_s26 + $0x38] sm:$0xff]  ;;  %v182_v22 = vld [vmem:[%s1654_s26 + $0x40] sm:$0xff] }
  0x15   : > { %v212_v19 = vld [vmem:[%s1654_s26 + $0x130] sm:$0xff]  ;;  %v213_v21 = vld [vmem:[%s1654_s26 + $0x138] sm:$0xff]  ;;  %v214_v23 = vld [vmem:[%s1654_s26 + $0x140] sm:$0xff] }
  0x16   : > { %1488 = vmatmul.mubr.msk.f32.gmra.mrb[2].mxu0 %vm249_vm0, %v177_v12  ;;  %v183_v24 = vld [vmem:[%s1654_s26 + $0x48] sm:$0xff]  ;;  %v184_v26 = vld [vmem:[%s1654_s26 + $0x50] sm:$0xff]  ;;  %v185_v28 = vld [vmem:[%s1654_s26 + $0x58] sm:$0xff] }
  0x17   : > { %1536 = vmatmul.mubr.msk.f32.gmra.mrb[2].mxu1 %vm249_vm0, %v209_v13  ;;  %1490 = vmatprep.mubr.msk.f32.mxu0 %vm249_vm0, %v178_v14  ;;  %v215_v25 = vld [vmem:[%s1654_s26 + $0x148] sm:$0xff]  ;;  %v216_v27 = vld [vmem:[%s1654_s26 + $0x150] sm:$0xff]  ;;  %v217_v29 = vld [vmem:[%s1654_s26 + $0x158] sm:$0xff] }
  0x18   : > { %1538 = vmatprep.mubr.msk.f32.mxu1 %vm249_vm0, %v210_v15  ;;  %v186_v30 = vld [vmem:[%s1654_s26 + $0x60] sm:$0xff]  ;;  %v187_v32 = vld [vmem:[%s1654_s26 + $0x68] sm:$0xff]  ;;  %v188_v34 = vld [vmem:[%s1654_s26 + $0x70] sm:$0xff] }
  0x19   : > { %v218_v31 = vld [vmem:[%s1654_s26 + $0x160] sm:$0xff]  ;;  %v219_v33 = vld [vmem:[%s1654_s26 + $0x168] sm:$0xff]  ;;  %v220_v35 = vld [vmem:[%s1654_s26 + $0x170] sm:$0xff] }
  0x1a   : > { %1491 = vmatmul.mubr.msk.f32.gmra.mrb[4].mxu0 %vm249_vm0, %v179_v16  ;;  %v189_v36 = vld [vmem:[%s1654_s26 + $0x78] sm:$0xff]  ;;  %v190_v38 = vld [vmem:[%s1654_s26 + $0x80] sm:$0xff]  ;;  %v191_v40 = vld [vmem:[%s1654_s26 + $0x88] sm:$0xff] }
  0x1b   : > { %1539 = vmatmul.mubr.msk.f32.gmra.mrb[4].mxu1 %vm249_vm0, %v211_v17  ;;  %1493 = vmatprep.mubr.msk.f32.mxu0 %vm249_vm0, %v180_v18  ;;  %v221_v37 = vld [vmem:[%s1654_s26 + $0x178] sm:$0xff]  ;;  %v222_v39 = vld [vmem:[%s1654_s26 + $0x180] sm:$0xff]  ;;  %v223_v41 = vld [vmem:[%s1654_s26 + $0x188] sm:$0xff] }
  0x1c   : > { %1541 = vmatprep.mubr.msk.f32.mxu1 %vm249_vm0, %v212_v19  ;;  %v192_v42 = vld [vmem:[%s1654_s26 + $0x90] sm:$0xff]  ;;  %v193_v44 = vld [vmem:[%s1654_s26 + $0x98] sm:$0xff]  ;;  %v194_v46 = vld [vmem:[%s1654_s26 + $0xa0] sm:$0xff] }
  0x1d   : > { %v224_v43 = vld [vmem:[%s1654_s26 + $0x190] sm:$0xff]  ;;  %v225_v45 = vld [vmem:[%s1654_s26 + $0x198] sm:$0xff]  ;;  %v226_v47 = vld [vmem:[%s1654_s26 + $0x1a0] sm:$0xff] }
  0x1e   : > { %1494 = vmatmul.mubr.msk.f32.gmra.mrb[6].mxu0 %vm249_vm0, %v181_v20  ;;  %v195_v48 = vld [vmem:[%s1654_s26 + $0xa8] sm:$0xff]  ;;  %v196_v50 = vld [vmem:[%s1654_s26 + $0xb0] sm:$0xff]  ;;  %v197_v52 = vld [vmem:[%s1654_s26 + $0xb8] sm:$0xff] }
  0x1f   : > { %1542 = vmatmul.mubr.msk.f32.gmra.mrb[6].mxu1 %vm249_vm0, %v213_v21  ;;  %1496 = vmatprep.mubr.msk.f32.mxu0 %vm249_vm0, %v182_v22  ;;  %v227_v49 = vld [vmem:[%s1654_s26 + $0x1a8] sm:$0xff]  ;;  %v228_v51 = vld [vmem:[%s1654_s26 + $0x1b0] sm:$0xff]  ;;  %v229_v53 = vld [vmem:[%s1654_s26 + $0x1b8] sm:$0xff] }
  0x20   : > { %1544 = vmatprep.mubr.msk.f32.mxu1 %vm249_vm0, %v214_v23  ;;  %v198_v54 = vld [vmem:[%s1654_s26 + $0xc0] sm:$0xff]  ;;  %v199_v56 = vld [vmem:[%s1654_s26 + $0xc8] sm:$0xff]  ;;  %v200_v58 = vld [vmem:[%s1654_s26 + $0xd0] sm:$0xff] }
  0x21   : > { %v230_v55 = vld [vmem:[%s1654_s26 + $0x1c0] sm:$0xff]  ;;  %v231_v57 = vld [vmem:[%s1654_s26 + $0x1c8] sm:$0xff]  ;;  %v232_v59 = vld [vmem:[%s1654_s26 + $0x1d0] sm:$0xff] }
  0x22   : > { %1497 = vmatmul.mubr.msk.f32.gmra.mrb[8].mxu0 %vm249_vm0, %v183_v24  ;;  %v201_v60 = vld [vmem:[%s1654_s26 + $0xd8] sm:$0xff]  ;;  %v202_v62 = vld [vmem:[%s1654_s26 + $0xe0] sm:$0xff]  ;;  %v203_v0 = vld [vmem:[%s1654_s26 + $0xe8] sm:$0xff] }
  0x23   : > { %1545 = vmatmul.mubr.msk.f32.gmra.mrb[8].mxu1 %vm249_vm0, %v215_v25  ;;  %1499 = vmatprep.mubr.msk.f32.mxu0 %vm249_vm0, %v184_v26  ;;  %v233_v61 = vld [vmem:[%s1654_s26 + $0x1d8] sm:$0xff]  ;;  %v234_v63 = vld [vmem:[%s1654_s26 + $0x1e0] sm:$0xff]  ;;  %v235_v1 = vld [vmem:[%s1654_s26 + $0x1e8] sm:$0xff] }
  0x24   : > { %1547 = vmatprep.mubr.msk.f32.mxu1 %vm249_vm0, %v216_v27  ;;  %v204_v2 = vld [vmem:[%s1654_s26 + $0xf0] sm:$0xff]  ;;  %v205_v4 = vld [vmem:[%s1654_s26 + $0xf8] sm:$0xff]  ;;  %v1787_v6 = vld [vmem:[%s1992_s2] ss:$0 sm:$0xff] }
  0x25   : > { %v236_v3 = vld [vmem:[%s1654_s26 + $0x1f0] sm:$0xff]  ;;  %v237_v5 = vld [vmem:[%s1654_s26 + $0x1f8] sm:$0xff] }
  0x26   : > { %1500 = vmatmul.mubr.msk.f32.gmra.mrb[10].mxu0 %vm249_vm0, %v185_v28 }
  0x27   : > { %1548 = vmatmul.mubr.msk.f32.gmra.mrb[10].mxu1 %vm249_vm0, %v217_v29  ;;  %1502 = vmatprep.mubr.msk.f32.mxu0 %vm249_vm0, %v186_v30 }
  0x28   : > { %1550 = vmatprep.mubr.msk.f32.mxu1 %vm249_vm0, %v218_v31 }
  0x2a   : > { %1503 = vmatmul.mubr.msk.f32.gmra.mrb[12].mxu0 %vm249_vm0, %v187_v32 }
  0x2b   : > { %1551 = vmatmul.mubr.msk.f32.gmra.mrb[12].mxu1 %vm249_vm0, %v219_v33  ;;  %1505 = vmatprep.mubr.msk.f32.mxu0 %vm249_vm0, %v188_v34 }
  0x2c   : > { %1553 = vmatprep.mubr.msk.f32.mxu1 %vm249_vm0, %v220_v35 }
  0x2e   : > { %1506 = vmatmul.mubr.msk.f32.gmra.mrb[14].mxu0 %vm249_vm0, %v189_v36 }
  0x2f   : > { %1554 = vmatmul.mubr.msk.f32.gmra.mrb[14].mxu1 %vm249_vm0, %v221_v37  ;;  %1508 = vmatprep.mubr.msk.f32.mxu0 %vm249_vm0, %v190_v38 }
  0x30   : > { %1556 = vmatprep.mubr.msk.f32.mxu1 %vm249_vm0, %v222_v39 }
  0x32   : > { %1509 = vmatmul.mubr.msk.f32.gmra.mrb[16].mxu0 %vm249_vm0, %v191_v40 }
  0x33   : > { %1557 = vmatmul.mubr.msk.f32.gmra.mrb[16].mxu1 %vm249_vm0, %v223_v41  ;;  %1511 = vmatprep.mubr.msk.f32.mxu0 %vm249_vm0, %v192_v42 }
  0x34   : > { %1559 = vmatprep.mubr.msk.f32.mxu1 %vm249_vm0, %v224_v43 }
  0x36   : > { %1512 = vmatmul.mubr.msk.f32.gmra.mrb[18].mxu0 %vm249_vm0, %v193_v44 }
  0x37   : > { %1560 = vmatmul.mubr.msk.f32.gmra.mrb[18].mxu1 %vm249_vm0, %v225_v45  ;;  %1514 = vmatprep.mubr.msk.f32.mxu0 %vm249_vm0, %v194_v46 }
  0x38   : > { %1562 = vmatprep.mubr.msk.f32.mxu1 %vm249_vm0, %v226_v47 }
  0x3a   : > { %1515 = vmatmul.mubr.msk.f32.gmra.mrb[20].mxu0 %vm249_vm0, %v195_v48 }
  0x3b   : > { %1563 = vmatmul.mubr.msk.f32.gmra.mrb[20].mxu1 %vm249_vm0, %v227_v49  ;;  %1517 = vmatprep.mubr.msk.f32.mxu0 %vm249_vm0, %v196_v50 }
  0x3c   : > { %1565 = vmatprep.mubr.msk.f32.mxu1 %vm249_vm0, %v228_v51 }
  0x3e   : > { %1518 = vmatmul.mubr.msk.f32.gmra.mrb[22].mxu0 %vm249_vm0, %v197_v52 }
  0x3f   : > { %1566 = vmatmul.mubr.msk.f32.gmra.mrb[22].mxu1 %vm249_vm0, %v229_v53  ;;  %1520 = vmatprep.mubr.msk.f32.mxu0 %vm249_vm0, %v198_v54 }
  0x40   : > { %1568 = vmatprep.mubr.msk.f32.mxu1 %vm249_vm0, %v230_v55 }
  0x42   : > { %1521 = vmatmul.mubr.msk.f32.gmra.mrb[24].mxu0 %vm249_vm0, %v199_v56 }
  0x43   : > { %1569 = vmatmul.mubr.msk.f32.gmra.mrb[24].mxu1 %vm249_vm0, %v231_v57  ;;  %1523 = vmatprep.mubr.msk.f32.mxu0 %vm249_vm0, %v200_v58 }
  0x44   : > { %1571 = vmatprep.mubr.msk.f32.mxu1 %vm249_vm0, %v232_v59 }
  0x46   : > { %1524 = vmatmul.mubr.msk.f32.gmra.mrb[26].mxu0 %vm249_vm0, %v201_v60 }
  0x47   : > { %1572 = vmatmul.mubr.msk.f32.gmra.mrb[26].mxu1 %vm249_vm0, %v233_v61  ;;  %1526 = vmatprep.mubr.msk.f32.mxu0 %vm249_vm0, %v202_v62 }
  0x48   : > { %1574 = vmatprep.mubr.msk.f32.mxu1 %vm249_vm0, %v234_v63 }
  0x4a   : > { %1527 = vmatmul.mubr.msk.f32.gmra.mrb[28].mxu0 %vm249_vm0, %v203_v0 }
  0x4b   : > { %1575 = vmatmul.mubr.msk.f32.gmra.mrb[28].mxu1 %vm249_vm0, %v235_v1  ;;  %1529 = vmatprep.mubr.msk.f32.mxu0 %vm249_vm0, %v204_v2 }
  0x4c   : > { %1577 = vmatprep.mubr.msk.f32.mxu1 %vm249_vm0, %v236_v3 }
  0x4e   : > { %1530 = vmatmul.mubr.msk.f32.gmra.mrb[30].mxu0 %vm249_vm0, %v205_v4 }
  0x4f   : > { %1578 = vmatmul.mubr.msk.f32.gmra.mrb[30].mxu1 %vm249_vm0, %v237_v5 }
  0xe5   : > { %v1486_v7 = vpop.f32.mrb[0].mxu0 }
  0xe6   : > { %v1534_v8 = vpop.f32.mrb[0].mxu1  ;;  %v514_v9 = vadd.f32 %v1486_v7, %v1787_v6  ;;  %v508_v11 = vpop.f32.mrb[1].mxu0 }
  0xe7   : > { %v674_v10 = vadd.f32 %v1534_v8, %v1787_v6  ;;  %v668_v12 = vpop.f32.mrb[1].mxu1  ;;  %v509_v13 = vadd.f32 %v1787_v6, %v508_v11 }
  0xe8   : > { %v669_v14 = vadd.f32 %v1787_v6, %v668_v12  ;;  %v1345_v15 = vpack.c.bf16 %v514_v9, %v514_v9 }
  0xe9   : > { %v1377_v16 = vpack.c.bf16 %v674_v10, %v674_v10  ;;  %v1344_v17 = vpack.c.bf16 %v509_v13, %v509_v13  ;;  %v1489_v19 = vpop.f32.mrb[2].mxu0 }
  0xea   : > { %v1376_v18 = vpack.c.bf16 %v669_v14, %v669_v14  ;;  %v1537_v20 = vpop.f32.mrb[2].mxu1  ;;  %1085 = vst.msk [vmem:[%s1795_s5 + $0x4] sm:$0xf] %vm1083_vm1, %v1345_v15  ;;  %v524_v21 = vadd.f32 %v1489_v19, %v1787_v6  ;;  %v518_v23 = vpop.f32.mrb[3].mxu0 }
  0xeb   : > { %1117 = vst.msk [vmem:[%s1795_s5 + $0x84] sm:$0xf] %vm1083_vm1, %v1377_v16  ;;  %v684_v22 = vadd.f32 %v1537_v20, %v1787_v6  ;;  %v678_v24 = vpop.f32.mrb[3].mxu1  ;;  %1084 = vst.msk [vmem:[%s1795_s5] sm:$0xf] %vm1083_vm1, %v1344_v17  ;;  %v519_v25 = vadd.f32 %v1787_v6, %v518_v23 }
  0xec   : > { %1116 = vst.msk [vmem:[%s1795_s5 + $0x80] sm:$0xf] %vm1083_vm1, %v1376_v18  ;;  %v679_v26 = vadd.f32 %v1787_v6, %v678_v24  ;;  %v1347_v27 = vpack.c.bf16 %v524_v21, %v524_v21 }
  0xed   : > { %v1379_v28 = vpack.c.bf16 %v684_v22, %v684_v22  ;;  %v1346_v29 = vpack.c.bf16 %v519_v25, %v519_v25  ;;  %v1492_v31 = vpop.f32.mrb[4].mxu0 }
  0xee   : > { %v1378_v30 = vpack.c.bf16 %v679_v26, %v679_v26  ;;  %v1540_v32 = vpop.f32.mrb[4].mxu1  ;;  %1087 = vst.msk [vmem:[%s1795_s5 + $0xc] sm:$0xf] %vm1083_vm1, %v1347_v27  ;;  %v534_v33 = vadd.f32 %v1492_v31, %v1787_v6  ;;  %v528_v35 = vpop.f32.mrb[5].mxu0 }
  0xef   : > { %1119 = vst.msk [vmem:[%s1795_s5 + $0x8c] sm:$0xf] %vm1083_vm1, %v1379_v28  ;;  %v694_v34 = vadd.f32 %v1540_v32, %v1787_v6  ;;  %v688_v36 = vpop.f32.mrb[5].mxu1  ;;  %1086 = vst.msk [vmem:[%s1795_s5 + $0x8] sm:$0xf] %vm1083_vm1, %v1346_v29  ;;  %v529_v37 = vadd.f32 %v1787_v6, %v528_v35 }
  0xf0   : > { %1118 = vst.msk [vmem:[%s1795_s5 + $0x88] sm:$0xf] %vm1083_vm1, %v1378_v30  ;;  %v689_v38 = vadd.f32 %v1787_v6, %v688_v36  ;;  %v1349_v39 = vpack.c.bf16 %v534_v33, %v534_v33 }
  0xf1   : > { %v1381_v40 = vpack.c.bf16 %v694_v34, %v694_v34  ;;  %v1348_v41 = vpack.c.bf16 %v529_v37, %v529_v37  ;;  %v1495_v43 = vpop.f32.mrb[6].mxu0 }
  0xf2   : > { %v1380_v42 = vpack.c.bf16 %v689_v38, %v689_v38  ;;  %v1543_v44 = vpop.f32.mrb[6].mxu1  ;;  %1089 = vst.msk [vmem:[%s1795_s5 + $0x14] sm:$0xf] %vm1083_vm1, %v1349_v39  ;;  %v544_v45 = vadd.f32 %v1495_v43, %v1787_v6  ;;  %v538_v47 = vpop.f32.mrb[7].mxu0 }
  0xf3   : > { %1121 = vst.msk [vmem:[%s1795_s5 + $0x94] sm:$0xf] %vm1083_vm1, %v1381_v40  ;;  %v704_v46 = vadd.f32 %v1543_v44, %v1787_v6  ;;  %v698_v48 = vpop.f32.mrb[7].mxu1  ;;  %1088 = vst.msk [vmem:[%s1795_s5 + $0x10] sm:$0xf] %vm1083_vm1, %v1348_v41  ;;  %v539_v49 = vadd.f32 %v1787_v6, %v538_v47 }
  0xf4   : > { %1120 = vst.msk [vmem:[%s1795_s5 + $0x90] sm:$0xf] %vm1083_vm1, %v1380_v42  ;;  %v699_v50 = vadd.f32 %v1787_v6, %v698_v48  ;;  %v1351_v51 = vpack.c.bf16 %v544_v45, %v544_v45 }
  0xf5   : > { %v1383_v52 = vpack.c.bf16 %v704_v46, %v704_v46  ;;  %v1350_v53 = vpack.c.bf16 %v539_v49, %v539_v49  ;;  %v1498_v55 = vpop.f32.mrb[8].mxu0 }
  0xf6   : > { %v1382_v54 = vpack.c.bf16 %v699_v50, %v699_v50  ;;  %v1546_v56 = vpop.f32.mrb[8].mxu1  ;;  %1091 = vst.msk [vmem:[%s1795_s5 + $0x1c] sm:$0xf] %vm1083_vm1, %v1351_v51  ;;  %v554_v57 = vadd.f32 %v1498_v55, %v1787_v6  ;;  %v548_v59 = vpop.f32.mrb[9].mxu0 }
  0xf7   : > { %1123 = vst.msk [vmem:[%s1795_s5 + $0x9c] sm:$0xf] %vm1083_vm1, %v1383_v52  ;;  %v714_v58 = vadd.f32 %v1546_v56, %v1787_v6  ;;  %v708_v60 = vpop.f32.mrb[9].mxu1  ;;  %1090 = vst.msk [vmem:[%s1795_s5 + $0x18] sm:$0xf] %vm1083_vm1, %v1350_v53  ;;  %v549_v61 = vadd.f32 %v1787_v6, %v548_v59 }
  0xf8   : > { %1122 = vst.msk [vmem:[%s1795_s5 + $0x98] sm:$0xf] %vm1083_vm1, %v1382_v54  ;;  %v709_v62 = vadd.f32 %v1787_v6, %v708_v60  ;;  %v1353_v63 = vpack.c.bf16 %v554_v57, %v554_v57 }
  0xf9   : > { %v1385_v0 = vpack.c.bf16 %v714_v58, %v714_v58  ;;  %v1352_v1 = vpack.c.bf16 %v549_v61, %v549_v61  ;;  %v1501_v3 = vpop.f32.mrb[10].mxu0 }
  0xfa   : > { %v1384_v2 = vpack.c.bf16 %v709_v62, %v709_v62  ;;  %v1549_v4 = vpop.f32.mrb[10].mxu1  ;;  %1093 = vst.msk [vmem:[%s1795_s5 + $0x24] sm:$0xf] %vm1083_vm1, %v1353_v63  ;;  %v564_v5 = vadd.f32 %v1501_v3, %v1787_v6  ;;  %v558_v8 = vpop.f32.mrb[11].mxu0 }
  0xfb   : > { %1125 = vst.msk [vmem:[%s1795_s5 + $0xa4] sm:$0xf] %vm1083_vm1, %v1385_v0  ;;  %v724_v7 = vadd.f32 %v1549_v4, %v1787_v6  ;;  %v718_v9 = vpop.f32.mrb[11].mxu1  ;;  %1092 = vst.msk [vmem:[%s1795_s5 + $0x20] sm:$0xf] %vm1083_vm1, %v1352_v1  ;;  %v559_v10 = vadd.f32 %v1787_v6, %v558_v8 }
  0xfc   : > { %1124 = vst.msk [vmem:[%s1795_s5 + $0xa0] sm:$0xf] %vm1083_vm1, %v1384_v2  ;;  %v719_v11 = vadd.f32 %v1787_v6, %v718_v9  ;;  %v1355_v12 = vpack.c.bf16 %v564_v5, %v564_v5 }
  0xfd   : > { %v1387_v13 = vpack.c.bf16 %v724_v7, %v724_v7  ;;  %v1354_v14 = vpack.c.bf16 %v559_v10, %v559_v10  ;;  %v1504_v16 = vpop.f32.mrb[12].mxu0 }
  0xfe   : > { %v1386_v15 = vpack.c.bf16 %v719_v11, %v719_v11  ;;  %v1552_v17 = vpop.f32.mrb[12].mxu1  ;;  %1095 = vst.msk [vmem:[%s1795_s5 + $0x2c] sm:$0xf] %vm1083_vm1, %v1355_v12  ;;  %v574_v18 = vadd.f32 %v1504_v16, %v1787_v6  ;;  %v568_v20 = vpop.f32.mrb[13].mxu0 }
  0xff   : > { %1127 = vst.msk [vmem:[%s1795_s5 + $0xac] sm:$0xf] %vm1083_vm1, %v1387_v13  ;;  %v734_v19 = vadd.f32 %v1552_v17, %v1787_v6  ;;  %v728_v21 = vpop.f32.mrb[13].mxu1  ;;  %1094 = vst.msk [vmem:[%s1795_s5 + $0x28] sm:$0xf] %vm1083_vm1, %v1354_v14  ;;  %v569_v22 = vadd.f32 %v1787_v6, %v568_v20 }
 0x100   : > { %1126 = vst.msk [vmem:[%s1795_s5 + $0xa8] sm:$0xf] %vm1083_vm1, %v1386_v15  ;;  %v729_v23 = vadd.f32 %v1787_v6, %v728_v21  ;;  %v1357_v24 = vpack.c.bf16 %v574_v18, %v574_v18 }
 0x101   : > { %v1389_v25 = vpack.c.bf16 %v734_v19, %v734_v19  ;;  %v1356_v26 = vpack.c.bf16 %v569_v22, %v569_v22  ;;  %v1507_v28 = vpop.f32.mrb[14].mxu0 }
 0x102   : > { %v1388_v27 = vpack.c.bf16 %v729_v23, %v729_v23  ;;  %v1555_v29 = vpop.f32.mrb[14].mxu1  ;;  %1097 = vst.msk [vmem:[%s1795_s5 + $0x34] sm:$0xf] %vm1083_vm1, %v1357_v24  ;;  %v584_v30 = vadd.f32 %v1507_v28, %v1787_v6  ;;  %v578_v32 = vpop.f32.mrb[15].mxu0 }
 0x103   : > { %1129 = vst.msk [vmem:[%s1795_s5 + $0xb4] sm:$0xf] %vm1083_vm1, %v1389_v25  ;;  %v744_v31 = vadd.f32 %v1555_v29, %v1787_v6  ;;  %v738_v33 = vpop.f32.mrb[15].mxu1  ;;  %1096 = vst.msk [vmem:[%s1795_s5 + $0x30] sm:$0xf] %vm1083_vm1, %v1356_v26  ;;  %v579_v34 = vadd.f32 %v1787_v6, %v578_v32 }
 0x104   : > { %1128 = vst.msk [vmem:[%s1795_s5 + $0xb0] sm:$0xf] %vm1083_vm1, %v1388_v27  ;;  %v739_v35 = vadd.f32 %v1787_v6, %v738_v33  ;;  %v1359_v36 = vpack.c.bf16 %v584_v30, %v584_v30 }
 0x105   : > { %v1391_v37 = vpack.c.bf16 %v744_v31, %v744_v31  ;;  %v1358_v38 = vpack.c.bf16 %v579_v34, %v579_v34  ;;  %v1510_v40 = vpop.f32.mrb[16].mxu0 }
 0x106   : > { %v1390_v39 = vpack.c.bf16 %v739_v35, %v739_v35  ;;  %v1558_v41 = vpop.f32.mrb[16].mxu1  ;;  %1099 = vst.msk [vmem:[%s1795_s5 + $0x3c] sm:$0xf] %vm1083_vm1, %v1359_v36  ;;  %v594_v42 = vadd.f32 %v1510_v40, %v1787_v6  ;;  %v588_v44 = vpop.f32.mrb[17].mxu0 }
 0x107   : > { %1131 = vst.msk [vmem:[%s1795_s5 + $0xbc] sm:$0xf] %vm1083_vm1, %v1391_v37  ;;  %v754_v43 = vadd.f32 %v1558_v41, %v1787_v6  ;;  %v748_v45 = vpop.f32.mrb[17].mxu1  ;;  %1098 = vst.msk [vmem:[%s1795_s5 + $0x38] sm:$0xf] %vm1083_vm1, %v1358_v38  ;;  %v589_v46 = vadd.f32 %v1787_v6, %v588_v44 }
 0x108   : > { %1130 = vst.msk [vmem:[%s1795_s5 + $0xb8] sm:$0xf] %vm1083_vm1, %v1390_v39  ;;  %v749_v47 = vadd.f32 %v1787_v6, %v748_v45  ;;  %v1361_v48 = vpack.c.bf16 %v594_v42, %v594_v42 }
 0x109   : > { %v1393_v49 = vpack.c.bf16 %v754_v43, %v754_v43  ;;  %v1360_v50 = vpack.c.bf16 %v589_v46, %v589_v46  ;;  %v1513_v52 = vpop.f32.mrb[18].mxu0 }
 0x10a   : > { %v1392_v51 = vpack.c.bf16 %v749_v47, %v749_v47  ;;  %v1561_v53 = vpop.f32.mrb[18].mxu1  ;;  %1101 = vst.msk [vmem:[%s1795_s5 + $0x44] sm:$0xf] %vm1083_vm1, %v1361_v48  ;;  %v604_v54 = vadd.f32 %v1513_v52, %v1787_v6  ;;  %v598_v56 = vpop.f32.mrb[19].mxu0 }
 0x10b   : > { %1133 = vst.msk [vmem:[%s1795_s5 + $0xc4] sm:$0xf] %vm1083_vm1, %v1393_v49  ;;  %v764_v55 = vadd.f32 %v1561_v53, %v1787_v6  ;;  %v758_v57 = vpop.f32.mrb[19].mxu1  ;;  %1100 = vst.msk [vmem:[%s1795_s5 + $0x40] sm:$0xf] %vm1083_vm1, %v1360_v50  ;;  %v599_v58 = vadd.f32 %v1787_v6, %v598_v56 }
 0x10c   : > { %1132 = vst.msk [vmem:[%s1795_s5 + $0xc0] sm:$0xf] %vm1083_vm1, %v1392_v51  ;;  %v759_v59 = vadd.f32 %v1787_v6, %v758_v57  ;;  %v1363_v60 = vpack.c.bf16 %v604_v54, %v604_v54 }
 0x10d   : > { %v1395_v61 = vpack.c.bf16 %v764_v55, %v764_v55  ;;  %v1362_v62 = vpack.c.bf16 %v599_v58, %v599_v58  ;;  %v1516_v0 = vpop.f32.mrb[20].mxu0 }
 0x10e   : > { %v1394_v63 = vpack.c.bf16 %v759_v59, %v759_v59  ;;  %v1564_v1 = vpop.f32.mrb[20].mxu1  ;;  %1103 = vst.msk [vmem:[%s1795_s5 + $0x4c] sm:$0xf] %vm1083_vm1, %v1363_v60  ;;  %v614_v2 = vadd.f32 %v1516_v0, %v1787_v6  ;;  %v608_v4 = vpop.f32.mrb[21].mxu0 }
 0x10f   : > { %1135 = vst.msk [vmem:[%s1795_s5 + $0xcc] sm:$0xf] %vm1083_vm1, %v1395_v61  ;;  %v774_v3 = vadd.f32 %v1564_v1, %v1787_v6  ;;  %v768_v5 = vpop.f32.mrb[21].mxu1  ;;  %1102 = vst.msk [vmem:[%s1795_s5 + $0x48] sm:$0xf] %vm1083_vm1, %v1362_v62  ;;  %v609_v7 = vadd.f32 %v1787_v6, %v608_v4 }
 0x110   : > { %1134 = vst.msk [vmem:[%s1795_s5 + $0xc8] sm:$0xf] %vm1083_vm1, %v1394_v63  ;;  %v769_v8 = vadd.f32 %v1787_v6, %v768_v5  ;;  %v1365_v9 = vpack.c.bf16 %v614_v2, %v614_v2 }
 0x111   : > { %v1397_v10 = vpack.c.bf16 %v774_v3, %v774_v3  ;;  %v1364_v11 = vpack.c.bf16 %v609_v7, %v609_v7  ;;  %v1519_v13 = vpop.f32.mrb[22].mxu0 }
 0x112   : > { %v1396_v12 = vpack.c.bf16 %v769_v8, %v769_v8  ;;  %v1567_v14 = vpop.f32.mrb[22].mxu1  ;;  %1105 = vst.msk [vmem:[%s1795_s5 + $0x54] sm:$0xf] %vm1083_vm1, %v1365_v9  ;;  %v624_v15 = vadd.f32 %v1519_v13, %v1787_v6  ;;  %v618_v17 = vpop.f32.mrb[23].mxu0 }
 0x113   : > { %1137 = vst.msk [vmem:[%s1795_s5 + $0xd4] sm:$0xf] %vm1083_vm1, %v1397_v10  ;;  %v784_v16 = vadd.f32 %v1567_v14, %v1787_v6  ;;  %v778_v18 = vpop.f32.mrb[23].mxu1  ;;  %1104 = vst.msk [vmem:[%s1795_s5 + $0x50] sm:$0xf] %vm1083_vm1, %v1364_v11  ;;  %v619_v19 = vadd.f32 %v1787_v6, %v618_v17 }
 0x114   : > { %1136 = vst.msk [vmem:[%s1795_s5 + $0xd0] sm:$0xf] %vm1083_vm1, %v1396_v12  ;;  %v779_v20 = vadd.f32 %v1787_v6, %v778_v18  ;;  %v1367_v21 = vpack.c.bf16 %v624_v15, %v624_v15 }
 0x115   : > { %v1399_v22 = vpack.c.bf16 %v784_v16, %v784_v16  ;;  %v1366_v23 = vpack.c.bf16 %v619_v19, %v619_v19  ;;  %v1522_v25 = vpop.f32.mrb[24].mxu0 }
 0x116   : > { %v1398_v24 = vpack.c.bf16 %v779_v20, %v779_v20  ;;  %v1570_v26 = vpop.f32.mrb[24].mxu1  ;;  %1107 = vst.msk [vmem:[%s1795_s5 + $0x5c] sm:$0xf] %vm1083_vm1, %v1367_v21  ;;  %v634_v27 = vadd.f32 %v1522_v25, %v1787_v6  ;;  %v628_v29 = vpop.f32.mrb[25].mxu0 }
 0x117   : > { %1139 = vst.msk [vmem:[%s1795_s5 + $0xdc] sm:$0xf] %vm1083_vm1, %v1399_v22  ;;  %v794_v28 = vadd.f32 %v1570_v26, %v1787_v6  ;;  %v788_v30 = vpop.f32.mrb[25].mxu1  ;;  %1106 = vst.msk [vmem:[%s1795_s5 + $0x58] sm:$0xf] %vm1083_vm1, %v1366_v23  ;;  %v629_v31 = vadd.f32 %v1787_v6, %v628_v29 }
 0x118   : > { %1138 = vst.msk [vmem:[%s1795_s5 + $0xd8] sm:$0xf] %vm1083_vm1, %v1398_v24  ;;  %v789_v32 = vadd.f32 %v1787_v6, %v788_v30  ;;  %v1369_v33 = vpack.c.bf16 %v634_v27, %v634_v27 }
 0x119   : > { %v1401_v34 = vpack.c.bf16 %v794_v28, %v794_v28  ;;  %v1368_v35 = vpack.c.bf16 %v629_v31, %v629_v31  ;;  %v1525_v37 = vpop.f32.mrb[26].mxu0 }
 0x11a   : > { %v1400_v36 = vpack.c.bf16 %v789_v32, %v789_v32  ;;  %v1573_v38 = vpop.f32.mrb[26].mxu1  ;;  %1109 = vst.msk [vmem:[%s1795_s5 + $0x64] sm:$0xf] %vm1083_vm1, %v1369_v33  ;;  %v644_v39 = vadd.f32 %v1525_v37, %v1787_v6  ;;  %v638_v41 = vpop.f32.mrb[27].mxu0 }
 0x11b   : > { %1141 = vst.msk [vmem:[%s1795_s5 + $0xe4] sm:$0xf] %vm1083_vm1, %v1401_v34  ;;  %v804_v40 = vadd.f32 %v1573_v38, %v1787_v6  ;;  %v798_v42 = vpop.f32.mrb[27].mxu1  ;;  %1108 = vst.msk [vmem:[%s1795_s5 + $0x60] sm:$0xf] %vm1083_vm1, %v1368_v35  ;;  %v639_v43 = vadd.f32 %v1787_v6, %v638_v41 }
 0x11c   : > { %1140 = vst.msk [vmem:[%s1795_s5 + $0xe0] sm:$0xf] %vm1083_vm1, %v1400_v36  ;;  %v799_v44 = vadd.f32 %v1787_v6, %v798_v42  ;;  %v1371_v45 = vpack.c.bf16 %v644_v39, %v644_v39 }
 0x11d   : > { %v1403_v46 = vpack.c.bf16 %v804_v40, %v804_v40  ;;  %v1370_v47 = vpack.c.bf16 %v639_v43, %v639_v43  ;;  %v1528_v49 = vpop.f32.mrb[28].mxu0 }
 0x11e   : > { %v1402_v48 = vpack.c.bf16 %v799_v44, %v799_v44  ;;  %v1576_v50 = vpop.f32.mrb[28].mxu1  ;;  %1111 = vst.msk [vmem:[%s1795_s5 + $0x6c] sm:$0xf] %vm1083_vm1, %v1371_v45  ;;  %v654_v51 = vadd.f32 %v1528_v49, %v1787_v6  ;;  %v648_v53 = vpop.f32.mrb[29].mxu0 }
 0x11f   : > { %1143 = vst.msk [vmem:[%s1795_s5 + $0xec] sm:$0xf] %vm1083_vm1, %v1403_v46  ;;  %v814_v52 = vadd.f32 %v1576_v50, %v1787_v6  ;;  %v808_v54 = vpop.f32.mrb[29].mxu1  ;;  %1110 = vst.msk [vmem:[%s1795_s5 + $0x68] sm:$0xf] %vm1083_vm1, %v1370_v47  ;;  %v649_v55 = vadd.f32 %v1787_v6, %v648_v53 }
 0x120   : > { %1142 = vst.msk [vmem:[%s1795_s5 + $0xe8] sm:$0xf] %vm1083_vm1, %v1402_v48  ;;  %v809_v56 = vadd.f32 %v1787_v6, %v808_v54  ;;  %v1373_v57 = vpack.c.bf16 %v654_v51, %v654_v51 }
 0x121   : > { %v1405_v58 = vpack.c.bf16 %v814_v52, %v814_v52  ;;  %v1372_v59 = vpack.c.bf16 %v649_v55, %v649_v55  ;;  %v1531_v61 = vpop.f32.mrb[30].mxu0 }
 0x122   : > { %v1404_v60 = vpack.c.bf16 %v809_v56, %v809_v56  ;;  %v1579_v62 = vpop.f32.mrb[30].mxu1  ;;  %1113 = vst.msk [vmem:[%s1795_s5 + $0x74] sm:$0xf] %vm1083_vm1, %v1373_v57  ;;  %v664_v63 = vadd.f32 %v1531_v61, %v1787_v6  ;;  %v658_v1 = vpop.f32.mrb[31].mxu0 }
 0x123   : > { %1145 = vst.msk [vmem:[%s1795_s5 + $0xf4] sm:$0xf] %vm1083_vm1, %v1405_v58  ;;  %v824_v0 = vadd.f32 %v1579_v62, %v1787_v6  ;;  %v818_v2 = vpop.f32.mrb[31].mxu1  ;;  %1112 = vst.msk [vmem:[%s1795_s5 + $0x70] sm:$0xf] %vm1083_vm1, %v1372_v59  ;;  %v659_v3 = vadd.f32 %v1787_v6, %v658_v1 }
 0x124   : > { %1144 = vst.msk [vmem:[%s1795_s5 + $0xf0] sm:$0xf] %vm1083_vm1, %v1404_v60  ;;  %v819_v4 = vadd.f32 %v1787_v6, %v818_v2  ;;  %v1375_v5 = vpack.c.bf16 %v664_v63, %v664_v63 }
 0x125   : > { %v1407_v7 = vpack.c.bf16 %v824_v0, %v824_v0  ;;  %v1374_v8 = vpack.c.bf16 %v659_v3, %v659_v3 }
 0x126   : > { %v1406_v9 = vpack.c.bf16 %v819_v4, %v819_v4  ;;  %1115 = vst.msk [vmem:[%s1795_s5 + $0x7c] sm:$0xf] %vm1083_vm1, %v1375_v5 }
 0x127   : > { %1147 = vst.msk [vmem:[%s1795_s5 + $0xfc] sm:$0xf] %vm1083_vm1, %v1407_v7  ;;  %1114 = vst.msk [vmem:[%s1795_s5 + $0x78] sm:$0xf] %vm1083_vm1, %v1374_v8 }
 0x128   : > { %1146 = vst.msk [vmem:[%s1795_s5 + $0xf8] sm:$0xf] %vm1083_vm1, %v1406_v9 }
 0x129 PF: > { %s13_s12 = sadd.s32 1, %s1606_s12  }
 0x12a   : > { %p10_p4 = scmp.ge.s32.totalorder %s13_s12, 4  }
 0x12c   :  { %12 = sbr.rel (!%p10_p4) target bundleno = 1 (0x1), region = 62 }

</bundles_post_ra>
